<compile_context>
chip_gen: v7x
topology: tpu7x:2x2x1
jax: 0.10.0
libtpu: 0.0.40
codegen_flags: <defaults>
</compile_context>

<pallas_src>
import functools
import math

import jax
import jax.numpy as jnp
from jax.experimental import pallas as pl
from jax.experimental.pallas import tpu as pltpu

PATCH = 8            # dino_vits8 patch size
EMBED_DIM = 384      # DINO ViT-S embedding dim (lane-dense: 3*128)
NUM_HEADS = 6
HEAD_DIM = EMBED_DIM // NUM_HEADS
IN_CHANS = 3

VMEM_LIMIT = 64 * 1024 * 1024   # explicit scoped-VMEM cap (<= physical on v5e/v6e/v7x)


# ----------------------------------------------------------------------------
# Kernel 1: patch embedding  (Conv2d(k=p, stride=p) as an im2col matmul)
# ----------------------------------------------------------------------------
def _patch_embed_kernel(x_ref, w_ref, b_ref, o_ref):
    # (TM, C*P*P) @ (C*P*P, D) + (1, D) ; bf16 MXU inputs, f32 accumulation.
    o_ref[...] = (
        jnp.dot(x_ref[...].astype(jnp.bfloat16), w_ref[...],
                preferred_element_type=jnp.float32)
        + b_ref[...]
    )


def patch_embed(patches_flat, w_pe, b_pe):
    """patches_flat: (B*S, C*P*P) f32 -> (B*S, D) f32."""
    m, kdim = patches_flat.shape
    d = w_pe.shape[1]
    # Large row tiles (mem-bound stage: ~0.35 us/step overhead amortized),
    # 'parallel' so both v7x TensorCores get work when grid_m >= 2.
    tm = min(m, 1024)
    grid_m = pl.cdiv(m, tm)
    return pl.pallas_call(
        _patch_embed_kernel,
        out_shape=jax.ShapeDtypeStruct((m, d), jnp.float32),
        grid=(grid_m,),
        in_specs=[
            pl.BlockSpec((tm, kdim), lambda i: (i, 0)),
            pl.BlockSpec((kdim, d), lambda i: (0, 0)),     # bf16 weights, DMA'd once
            pl.BlockSpec((1, d), lambda i: (0, 0)),
        ],
        out_specs=pl.BlockSpec((tm, d), lambda i: (i, 0)),
        compiler_params=pltpu.CompilerParams(
            dimension_semantics=("parallel",),
            vmem_limit_bytes=VMEM_LIMIT),
    )(patches_flat, w_pe, b_pe)


# ----------------------------------------------------------------------------
# Kernel 2: fused token assembly + last attention block (hooks 'qkv' / 'proj')
#           grid over batch, one batch element per grid step.
# ----------------------------------------------------------------------------
def _vit_block_kernel(ptok_ref, cls_ref, pos_ref, g_ref, be_ref,
                      wqkv_ref, bqkv_ref, wproj_ref, bproj_ref,
                      qkv_out_ref, proj_out_ref,
                      tok_scr, qkv_bf_scr, attn_scr,
                      *, seq, t, t_pad, tq):
    """One batch element per invocation.

    ptok_ref : (S, D) f32        patch tokens for this batch element
    outputs  : qkv_out_ref (T_pad, 3D) f32  == attn.qkv hook  (rows >= T are pad)
               proj_out_ref (T_pad, D) f32  == attn.proj hook (rows >= T are pad)
    scratch  : tok_scr    (T_pad, D)  f32   assembled tokens (pad rows zeroed)
               qkv_bf_scr (T_pad, 3D) bf16  scaled-q / k / v attention operands
               attn_scr   (T_pad, D)  bf16  per-head attention outputs
    """
    d = EMBED_DIM
    scale = 1.0 / math.sqrt(HEAD_DIM)
    n_q = (t_pad + tq - 1) // tq          # static python int

    # --- token assembly: CLS concat + positional add (pad rows zeroed) ------
    tok_scr[...] = jnp.zeros_like(tok_scr)
    tok_scr[0:1, :] = cls_ref[...] + pos_ref[0:1, :]
    tok_scr[1:t, :] = ptok_ref[...] + pos_ref[1:t, :]
    tok = tok_scr[...]                                       # (T_pad, D) f32

    # --- norm1 (pre-attention LayerNorm), f32 VPU math -----------------------
    mu = jnp.mean(tok, axis=-1, keepdims=True)
    xc = tok - mu
    var = jnp.mean(xc * xc, axis=-1, keepdims=True)
    tok_n = xc * jax.lax.rsqrt(var + 1e-6) * g_ref[...] + be_ref[...]

    # --- qkv linear  ->  hook 'qkv' ------------------------------------------
    qkv = (jnp.dot(tok_n.astype(jnp.bfloat16), wqkv_ref[...],
                   preferred_element_type=jnp.float32)
           + bqkv_ref[...])                                  # (T_pad, 3D) f32
    qkv_out_ref[...] = qkv

    # --- single slab-wide bf16 cast of the attention operands ---------------
    # 1/sqrt(head_dim) is folded into q here (one vmul pass, lane-tile-aligned
    # column stores at offsets 0 / 384).
    qkv_bf_scr[:, 0:d] = (qkv[:, 0:d] * scale).astype(jnp.bfloat16)
    qkv_bf_scr[:, d:3 * d] = qkv[:, d:3 * d].astype(jnp.bfloat16)

    if t_pad > t:
        key_ids = jax.lax.broadcasted_iota(jnp.int32, (1, t_pad), 1)

    # --- multi-head self-attention -------------------------------------------
    # Static 6-way head loop (static lane offsets); query rows tiled with a
    # fori_loop so the score matrix is (tq, T_pad) instead of (T, T).
    for h in range(NUM_HEADS):
        c0 = h * HEAD_DIM
        k_h = qkv_bf_scr[:, d + c0:d + c0 + HEAD_DIM]        # (T_pad, 64) bf16
        v_h = qkv_bf_scr[:, 2 * d + c0:2 * d + c0 + HEAD_DIM]

        def q_block(i, carry, c0=c0, k_h=k_h, v_h=v_h):
            # clamped start: last block overlaps instead of reading OOB
            q0 = jnp.minimum(i * tq, t_pad - tq)
            q0 = pl.multiple_of(q0, 8)
            q_blk = qkv_bf_scr[pl.ds(q0, tq), c0:c0 + HEAD_DIM]   # scaled q, bf16
            # contract last dims of q and k directly (no k.T transpose)
            s = jax.lax.dot_general(
                q_blk, k_h, (((1,), (1,)), ((), ())),
                preferred_element_type=jnp.float32)               # (tq, T_pad)
            if t_pad > t:
                s = jnp.where(key_ids < t, s, -1e30)              # mask pad keys
            s = s - jnp.max(s, axis=-1, keepdims=True)
            e = jnp.exp(s)
            p = e * pl.reciprocal(jnp.sum(e, axis=-1, keepdims=True), approx=True)
            o = jnp.dot(p.astype(jnp.bfloat16), v_h,
                        preferred_element_type=jnp.float32)       # (tq, 64)
            attn_scr[pl.ds(q0, tq), c0:c0 + HEAD_DIM] = o.astype(jnp.bfloat16)
            return carry

        jax.lax.fori_loop(0, n_q, q_block, 0)

    # --- proj linear  ->  hook 'proj' -----------------------------------------
    proj_out_ref[...] = (
        jnp.dot(attn_scr[...], wproj_ref[...],
                preferred_element_type=jnp.float32)
        + bproj_ref[...])


def fused_last_block(ptok, cls_tok, pos, ln_g, ln_b,
                     w_qkv, b_qkv, w_proj, b_proj, *, batch, seq):
    d = EMBED_DIM
    t = seq + 1
    t_pad = ((t + 7) // 8) * 8           # sublane-aligned token count
    tq = min(t_pad, 256)                 # query-row tile (MXU M fill, bounded scores)
    kernel = functools.partial(_vit_block_kernel, seq=seq, t=t, t_pad=t_pad, tq=tq)
    return pl.pallas_call(
        kernel,
        out_shape=(
            jax.ShapeDtypeStruct((batch, t_pad, 3 * d), jnp.float32),  # qkv hook
            jax.ShapeDtypeStruct((batch, t_pad, d), jnp.float32),      # proj hook
        ),
        grid=(batch,),
        in_specs=[
            pl.BlockSpec((None, seq, d), lambda b: (b, 0, 0)),   # ptok, per batch
            pl.BlockSpec((1, d), lambda b: (0, 0)),              # cls
            pl.BlockSpec((t, d), lambda b: (0, 0)),              # pos
            pl.BlockSpec((1, d), lambda b: (0, 0)),              # ln gamma
            pl.BlockSpec((1, d), lambda b: (0, 0)),              # ln beta
            pl.BlockSpec((d, 3 * d), lambda b: (0, 0)),          # w_qkv (bf16)
            pl.BlockSpec((1, 3 * d), lambda b: (0, 0)),          # b_qkv
            pl.BlockSpec((d, d), lambda b: (0, 0)),              # w_proj (bf16)
            pl.BlockSpec((1, d), lambda b: (0, 0)),              # b_proj
        ],
        out_specs=(
            pl.BlockSpec((None, t_pad, 3 * d), lambda b: (b, 0, 0)),
            pl.BlockSpec((None, t_pad, d), lambda b: (b, 0, 0)),
        ),
        scratch_shapes=[
            pltpu.VMEM((t_pad, d), jnp.float32),        # assembled tokens
            pltpu.VMEM((t_pad, 3 * d), jnp.bfloat16),   # scaled q / k / v
            pltpu.VMEM((t_pad, d), jnp.bfloat16),       # attention head outputs
        ],
        compiler_params=pltpu.CompilerParams(
            dimension_semantics=("parallel",),
            vmem_limit_bytes=VMEM_LIMIT),
    )(ptok.reshape(batch, seq, d), cls_tok, pos, ln_g, ln_b,
      w_qkv, b_qkv, w_proj, b_proj)


# ----------------------------------------------------------------------------
# DeepSpectral (forward only) with deterministic synthetic parameters
# ----------------------------------------------------------------------------
class DeepSpectralPallas:
    def __init__(self, key):
        keys = jax.random.split(key, 6)
        scale = 0.02
        pdim = IN_CHANS * PATCH * PATCH
        f32, bf16 = jnp.float32, jnp.bfloat16

        self.patch_size = PATCH
        self.embed_dim = EMBED_DIM

        # patch_embed (Conv2d(kernel=p, stride=p) expressed as matmul); bf16 MXU weights
        self.w_pe = (jax.random.normal(keys[0], (pdim, EMBED_DIM)) * scale).astype(bf16)
        self.b_pe = jnp.zeros((1, EMBED_DIM), f32)
        # CLS token / positional embedding (cached per token count)
        self.cls = (jax.random.normal(keys[1], (1, EMBED_DIM)) * scale).astype(f32)
        self._pos_key = keys[2]
        self._pos_cache = {}
        # last block: norm1 + attn.qkv + attn.proj
        self.ln_g = jnp.ones((1, EMBED_DIM), f32)
        self.ln_b = jnp.zeros((1, EMBED_DIM), f32)
        self.w_qkv = (jax.random.normal(keys[3], (EMBED_DIM, 3 * EMBED_DIM)) * scale).astype(bf16)
        self.b_qkv = jnp.zeros((1, 3 * EMBED_DIM), f32)
        self.w_proj = (jax.random.normal(keys[4], (EMBED_DIM, EMBED_DIM)) * scale).astype(bf16)
        self.b_proj = jnp.zeros((1, EMBED_DIM), f32)

    def _pos_embed(self, t):
        # Cached: only generated once per token count, not every forward().
        if t not in self._pos_cache:
            self._pos_cache[t] = (
                jax.random.normal(self._pos_key, (t, EMBED_DIM)) * 0.02
            ).astype(jnp.float32)
        return self._pos_cache[t]

    def forward(self, x):
        """x: (b, c, h, w) NCHW float32 -> (proj, q, k, v, p_size)."""
        b, c, h, w = x.shape
        p = self.patch_size
        h_p, w_p = h // p, w // p
        h_size, w_size = h_p * p, w_p * p
        s = h_p * w_p
        t = s + 1
        d = self.embed_dim

        # F.interpolate(..., mode='bilinear') to (h_size, w_size) is the identity
        # when h, w are multiples of p (the case constructed here).
        # TODO(synk): general bilinear resize for non-patch-aligned spatial sizes.
        x_resized = x[:, :, :h_size, :w_size]

        # non-overlapping patches in (c, p, p) order == Conv2d(k=p, stride=p) im2col
        # TODO(synk): fuse this im2col rearrangement into the patch_embed kernel
        # (per-patch-row BlockSpec + in-VMEM rearrange) to avoid the HBM round-trip.
        patches = x_resized.reshape(b, c, h_p, p, w_p, p)
        patches = jnp.transpose(patches, (0, 2, 4, 1, 3, 5)).reshape(b * s, c * p * p)

        ptok = patch_embed(patches, self.w_pe, self.b_pe)        # (b*s, D)
        pos = self._pos_embed(t)                                 # (t, D)

        # TODO(synk): torch.hub DINO backbone blocks[:-1] are not reproducible
        # without the checkpoint; only the hooked last attention block runs.
        qkv_pad, proj_pad = fused_last_block(
            ptok, self.cls, pos, self.ln_g, self.ln_b,
            self.w_qkv, self.b_qkv, self.w_proj, self.b_proj,
            batch=b, seq=s)

        # qkv.reshape(b, s+1, 3, D).permute(2,0,1,3)[:, :, 1:, :] -> q, k, v (b, s, D)
        # (rows >= t in the padded hook slabs are never used)
        q = qkv_pad[:, 1:t, 0:d]
        k = qkv_pad[:, 1:t, d:2 * d]
        v = qkv_pad[:, 1:t, 2 * d:3 * d]
        proj = proj_pad[:, 1:t, :]          # proj[:, 1:, :]
        return proj, q, k, v, (h_p, w_p)


if __name__ == "__main__":
    key = jax.random.PRNGKey(0)
    k_model, k_x = jax.random.split(key)
    model = DeepSpectralPallas(k_model)

    # small deterministic NCHW input: batch=2, channels=3, 32x32 (patch=8 -> 4x4 grid)
    x = jax.random.normal(k_x, (2, IN_CHANS, 32, 32), jnp.float32)

    proj, q, k, v, p_size = model.forward(x)
    jax.block_until_ready((proj, q, k, v))

    s = p_size[0] * p_size[1]
    assert p_size == (4, 4)
    assert proj.shape == (2, s, EMBED_DIM)
    assert q.shape == (2, s, EMBED_DIM)
    assert k.shape == (2, s, EMBED_DIM)
    assert v.shape == (2, s, EMBED_DIM)
    print("KERNEL_OK")
</pallas_src>

<mosaic_0001>
module attributes {stable_mosaic.version = 11 : i64} {
  func.func @_patch_embed_kernel(%arg0: i32, %arg1: memref<32x192xf32, #tpu.memory_space<vmem>>, %arg2: memref<192x384xbf16, #tpu.memory_space<vmem>>, %arg3: memref<1x384xf32, #tpu.memory_space<vmem>>, %arg4: memref<32x384xf32, #tpu.memory_space<vmem>>) attributes {dimension_semantics = [#tpu.dimension_semantics<parallel>], iteration_bounds = array<i64: 1>, scalar_prefetch = 0 : i64, scratch_operands = 0 : i64, tpu.core_type = #tpu.core_type<tc>, window_params = [{transform_indices = @transform_0, window_bounds = array<i64: 32, 192>}, {pipeline_mode = #tpu.pipeline_mode<synchronous>, transform_indices = @transform_1, window_bounds = array<i64: 192, 384>}, {pipeline_mode = #tpu.pipeline_mode<synchronous>, transform_indices = @transform_2, window_bounds = array<i64: 1, 384>}, {transform_indices = @transform_3, window_bounds = array<i64: 32, 384>}]} {
    %c0 = arith.constant 0 : index
    %c0_0 = arith.constant 0 : index
    %0 = vector.load %arg1[%c0, %c0_0] : memref<32x192xf32, #tpu.memory_space<vmem>>, vector<32x192xf32>
    %1 = arith.truncf %0 : vector<32x192xf32> to vector<32x192xbf16>
    %c0_1 = arith.constant 0 : index
    %c0_2 = arith.constant 0 : index
    %2 = vector.load %arg2[%c0_1, %c0_2] : memref<192x384xbf16, #tpu.memory_space<vmem>>, vector<192x384xbf16>
    %cst = arith.constant dense<0.000000e+00> : vector<32x384xf32>
    %3 = tpu.matmul %1, %2, %cst {dimension_numbers = #tpu.dot_dimension_numbers<[1], [0], [0], [1], [0, 0, 1, 1], [], []>} : vector<32x192xbf16>, vector<192x384xbf16>, vector<32x384xf32> -> vector<32x384xf32>
    %c0_3 = arith.constant 0 : index
    %c0_4 = arith.constant 0 : index
    %4 = vector.load %arg3[%c0_3, %c0_4] : memref<1x384xf32, #tpu.memory_space<vmem>>, vector<1x384xf32>
    %5 = vector.broadcast %4 : vector<1x384xf32> to vector<32x384xf32>
    %6 = arith.addf %3, %5 : vector<32x384xf32>
    %c0_5 = arith.constant 0 : index
    %c0_6 = arith.constant 0 : index
    %7 = vector.load %arg4[%c0_5, %c0_6] : memref<32x384xf32, #tpu.memory_space<vmem>>, vector<32x384xf32>
    tpu.vector_store %arg4[%c0_5, %c0_6], %6 {strides = array<i32>} : memref<32x384xf32, #tpu.memory_space<vmem>>, vector<32x384xf32>,
    return
  }
  func.func @transform_0(%arg0: i32) -> (i32, i32) {
    %c0_i32 = arith.constant 0 : i32
    %c0_i32_0 = arith.constant 0 : i32
    return %arg0, %c0_i32 : i32, i32
  }
  func.func @transform_1(%arg0: i32) -> (i32, i32) {
    %c0_i32 = arith.constant 0 : i32
    %c0_i32_0 = arith.constant 0 : i32
    %c0_i32_1 = arith.constant 0 : i32
    return %c0_i32, %c0_i32_0 : i32, i32
  }
  func.func @transform_2(%arg0: i32) -> (i32, i32) {
    %c0_i32 = arith.constant 0 : i32
    %c0_i32_0 = arith.constant 0 : i32
    %c0_i32_1 = arith.constant 0 : i32
    return %c0_i32, %c0_i32_0 : i32, i32
  }
  func.func @transform_3(%arg0: i32) -> (i32, i32) {
    %c0_i32 = arith.constant 0 : i32
    %c0_i32_0 = arith.constant 0 : i32
    return %arg0, %c0_i32 : i32, i32
  }
}

</mosaic_0001>

<bundles_post_ra>
// kernel: tpu_custom_call.1
= control target key start
LH: loop header
LB: loop body
LE: loop exit
PB: predicated region body
PF: predicated region fallthrough
CT: control target
= control target key end

     0   :  { %8 = vsyncpa [#allocation3], 0  ;;  %s751_s0 = inlined_call_operand.hbm [shape: f32[32,192], index: 0, kind: input, shape index: {}]   ;;  %s752_s1 = inlined_call_operand.hbm [shape: bf16[192,384], index: 1, kind: input, shape index: {}]   ;;  %s753_s2 = inlined_call_operand.hbm [shape: f32[1,384], index: 2, kind: input, shape index: {}]   ;;  %s754_s3 = inlined_call_operand.hbm [shape: f32[32,384], index: 3, kind: output, shape index: {}]  }
   0x1   :  { %9 = vsyncpa [#allocation6], 0 }
   0x2   :  { %10 = vsyncpa [#allocation4], 0  ;;  %s656_s12 = smov [#allocation5]   ;;  %s562_s16 = scalar_lea.hbm %s752_s1, 4608 }
   0x3   :  { %s28_s13 = sshll.u32 %s656_s12, 4  ;;  %p563_p0 = scmp.ne.s32.totalorder %s752_s1, %s562_s16  ;;  %s29_s13 = int_to_ptr.vmem [resolvable:$true] %s28_s13 }
   0x4   :  { %p566_p1 = scmp.lt.u32.totalorder %s562_s16, %s752_s1 }
   0x6   :  { %p568_p2 = pnand %p566_p1, %p563_p0 }
   0x8   :  { %571 = shalt.err (!%p568_p2)
}
   0x9   :  { %s572_s21 = scalar_lea.vmem %s29_s13, 4608  ;;  %p577_p4 = scmp.lt.s32.totalorder %s29_s13, %s29_s13 }
   0xa   :  { %p573_p3 = scmp.ne.s32.totalorder %s29_s13, %s572_s21  ;;  %p578_p5 = scmp.lt.s32.totalorder %s572_s21, %s572_s21 }
   0xc   :  { %p579_p6 = por %p578_p5, %p577_p4 }
   0xe   :  { %p580_p7 = pnand %p579_p6, %p573_p3 }
  0x10   :  { %583 = shalt.err (!%p580_p7)
}
  0x11   :  { %s657_s22 = smov 192   ;;  %s658_s23 = smov 12  }
  0x12   :  { %34 = dma.hbm_to_vmem [thread:$0]  %s752_s1, 4608, %s29_s13, [#allocation6], %s657_s22, %s657_s22, %s658_s23  }
  0x13   :  { %s659_s26 = smov [#allocation2]   ;;  %s584_s30 = scalar_lea.hbm %s751_s0, 1024 }
  0x14   :  { %s16_s27 = sshll.u32 %s659_s26, 4  ;;  %p585_p8 = scmp.ne.s32.totalorder %s751_s0, %s584_s30  ;;  %s17_s27 = int_to_ptr.vmem [resolvable:$true] %s16_s27 }
  0x15   :  { %p588_p9 = scmp.lt.u32.totalorder %s584_s30, %s751_s0 }
  0x17   :  { %p590_p10 = pnand %p588_p9, %p585_p8 }
  0x19   :  { %593 = shalt.err (!%p590_p10)
}
  0x1a   :  { %s594_s8 = scalar_lea.vmem %s17_s27, 1024  ;;  %p599_p12 = scmp.lt.s32.totalorder %s17_s27, %s17_s27 }
  0x1b   :  { %p595_p11 = scmp.ne.s32.totalorder %s17_s27, %s594_s8  ;;  %p600_p13 = scmp.lt.s32.totalorder %s594_s8, %s594_s8 }
  0x1d   :  { %p601_p0 = por %p600_p13, %p599_p12 }
  0x1f   :  { %p602_p1 = pnand %p601_p0, %p595_p11 }
  0x21   :  { %605 = shalt.err (!%p602_p1)
}
  0x22   :  { %s660_s1 = smov 256   ;;  %s661_s9 = smov 16  }
  0x23   :  { %22 = dma.hbm_to_vmem [thread:$0]  %s751_s0, 1024, %s17_s27, [#allocation3], %s660_s1, %s660_s1, %s661_s9  }
  0x24   :  { %s662_s12 = smov [#allocation7]   ;;  %s606_s16 = scalar_lea.hbm %s753_s2, 48 }
  0x25   :  { %s41_s13 = sshll.u32 %s662_s12, 4  ;;  %p607_p2 = scmp.ne.s32.totalorder %s753_s2, %s606_s16  ;;  %s42_s13 = int_to_ptr.vmem [resolvable:$true] %s41_s13 }
  0x26   :  { %p610_p3 = scmp.lt.u32.totalorder %s606_s16, %s753_s2 }
  0x28   :  { %p612_p4 = pnand %p610_p3, %p607_p2 }
  0x2a   :  { %615 = shalt.err (!%p612_p4)
}
  0x2b   :  { %s616_s21 = scalar_lea.vmem %s42_s13, 48  ;;  %s620_s0 = scalar_lea.vmem %s42_s13, 64 }
  0x2c   :  { %p617_p5 = scmp.ne.s32.totalorder %s42_s13, %s616_s21  ;;  %p621_p6 = scmp.lt.s32.totalorder %s42_s13, %s42_s13 }
  0x2d   :  { %p622_p7 = scmp.lt.s32.totalorder %s620_s0, %s616_s21 }
  0x2f   :  { %p623_p8 = por %p622_p7, %p621_p6 }
  0x31   :  { %p624_p9 = pnand %p623_p8, %p617_p5 }
  0x33   :  { %627 = shalt.err (!%p624_p9)
}
  0x34   :  { %44 = dma.hbm_to_vmem [thread:$0]  %s753_s2, 48, %s42_s13, [#allocation6]  }
  0x35   :  { %650 = dma.done.wait [#allocation3], 1024  }
  0x36   :  { %651 = vsyncadd [#allocation3], 4294966272 }
  0x37   :  { %652 = dma.done.wait [#allocation6], 4656  }
  0x38   :  { %653 = vsyncadd [#allocation6], 4294962640  ;;  %v663_v0 = vmov 0   ;;  %v514_v1 = vld [vmem:[#allocation5 + $0x4] ss:$12 sps:$4 sm:$0xff]   ;;  %v56_v25 = vld [vmem:[#allocation2 + $0x8] sm:$0xff]  ;;  %v117_v49 = vlaneseq }
  0x39   :  { %384 = vmatprep.subr.bf16.mxu1 %v663_v0  ;;  %v516_v2 = vld [vmem:[#allocation5 + $0x8] ss:$12 sps:$4 sm:$0xff]   ;;  %331 = vmatprep.subr.bf16.mxu0 %v514_v1  ;;  %v517_v3 = vld [vmem:[#allocation5] ss:$12 sps:$4 sm:$0xff]   ;;  %v521_v6 = vld [vmem:[#allocation5 + $0x18] ss:$12 sps:$4 sm:$0xff]  }
  0x3a   :  { %385 = vmatpush1.bf16.msra.mxu1 %v516_v2  ;;  %v518_v4 = vld [vmem:[#allocation5 + $0x1c] ss:$12 sps:$4 sm:$0xff]   ;;  %332 = vmatpush1.bf16.msra.mxu0 %v517_v3  ;;  %v520_v5 = vld [vmem:[#allocation5 + $0x20] ss:$12 sps:$4 sm:$0xff]   ;;  %v524_v8 = vld [vmem:[#allocation5 + $0x38] ss:$12 sps:$4 sm:$0xff]  }
  0x3b   :  { %386 = vmatprep.subr.bf16.mxu1 %v663_v0  ;;  %333 = vmatprep.subr.bf16.mxu0 %v518_v4  ;;  %v522_v7 = vld [vmem:[#allocation5 + $0x34] ss:$12 sps:$4 sm:$0xff]   ;;  %v525_v9 = vld [vmem:[#allocation5 + $0x30] ss:$12 sps:$4 sm:$0xff]   ;;  %v526_v10 = vld [vmem:[#allocation5 + $0x4c] ss:$12 sps:$4 sm:$0xff]  }
  0x3c   :  { %v528_v11 = vld [vmem:[#allocation5 + $0x50] ss:$12 sps:$4 sm:$0xff]   ;;  %v529_v12 = vld [vmem:[#allocation5 + $0x48] ss:$12 sps:$4 sm:$0xff]   ;;  %v533_v15 = vld [vmem:[#allocation5 + $0x60] ss:$12 sps:$4 sm:$0xff]  }
  0x3d   :  { %v530_v13 = vld [vmem:[#allocation5 + $0x64] ss:$12 sps:$4 sm:$0xff]   ;;  %v532_v14 = vld [vmem:[#allocation5 + $0x68] ss:$12 sps:$4 sm:$0xff]   ;;  %v536_v17 = vld [vmem:[#allocation5 + $0x80] ss:$12 sps:$4 sm:$0xff]  }
  0x3e   :  { %387 = vmatpush1.bf16.msra.mxu1 %v520_v5  ;;  %334 = vmatpush1.bf16.msra.mxu0 %v521_v6  ;;  %v534_v16 = vld [vmem:[#allocation5 + $0x7c] ss:$12 sps:$4 sm:$0xff]   ;;  %v537_v18 = vld [vmem:[#allocation5 + $0x78] ss:$12 sps:$4 sm:$0xff]   ;;  %v538_v19 = vld [vmem:[#allocation5 + $0x94] ss:$12 sps:$4 sm:$0xff]  }
  0x3f   :  { %388 = vmatprep.subr.bf16.mxu1 %v663_v0  ;;  %335 = vmatprep.subr.bf16.mxu0 %v522_v7  ;;  %v540_v20 = vld [vmem:[#allocation5 + $0x98] ss:$12 sps:$4 sm:$0xff]   ;;  %v541_v21 = vld [vmem:[#allocation5 + $0x90] ss:$12 sps:$4 sm:$0xff]   ;;  %v545_v24 = vld [vmem:[#allocation5 + $0xa8] ss:$12 sps:$4 sm:$0xff]  }
  0x40   :  { %v542_v22 = vld [vmem:[#allocation5 + $0xac] ss:$12 sps:$4 sm:$0xff]   ;;  %v544_v23 = vld [vmem:[#allocation5 + $0xb0] ss:$12 sps:$4 sm:$0xff]   ;;  %vm324_vm0 = vcmask 523264   ;;  %v55_v39 = vld [vmem:[#allocation2] sm:$0xff] }
  0x41   :  { %v58_v26 = vld [vmem:[#allocation2 + $0x18] sm:$0xff]  ;;  %v546_v27 = vld [vmem:[#allocation5 + $0xc4] ss:$12 sps:$4 sm:$0xff]   ;;  %v548_v29 = vld [vmem:[#allocation5 + $0xc8] ss:$12 sps:$4 sm:$0xff]   ;;  %v118_v50 = vshrl.u32 %v117_v49, 7 }
  0x42   :  { %389 = vmatpush1.bf16.msra.mxu1 %v524_v8  ;;  %336 = vmatpush1.bf16.msra.mxu0 %v525_v9  ;;  %v64_v28 = vpack.c.bf16 %v58_v26, %v56_v25  ;;  %v549_v30 = vld [vmem:[#allocation5 + $0xc0] ss:$12 sps:$4 sm:$0xff]   ;;  %v550_v31 = vld [vmem:[#allocation5 + $0xdc] ss:$12 sps:$4 sm:$0xff]   ;;  %v553_v33 = vld [vmem:[#allocation5 + $0xd8] ss:$12 sps:$4 sm:$0xff]  }
  0x43   :  { %390 = vmatprep.subr.bf16.mxu1 %v663_v0  ;;  %337 = vmatprep.subr.bf16.mxu0 %v526_v10  ;;  %v552_v32 = vld [vmem:[#allocation5 + $0xe0] ss:$12 sps:$4 sm:$0xff]   ;;  %v556_v35 = vld [vmem:[#allocation5 + $0xf8] ss:$12 sps:$4 sm:$0xff]   ;;  %v557_v36 = vld [vmem:[#allocation5 + $0xf0] ss:$12 sps:$4 sm:$0xff]  }
  0x44   :  { %501 = vmatprep.mubr.msk.bf16.mxu1 %vm324_vm0, %v64_v28  ;;  %499 = vmatprep.mubr.msk.bf16.mxu0 %vm324_vm0, %v64_v28  ;;  %v554_v34 = vld [vmem:[#allocation5 + $0xf4] ss:$12 sps:$4 sm:$0xff]   ;;  %v558_v37 = vld [vmem:[#allocation5 + $0x10c] ss:$12 sps:$4 sm:$0xff]   ;;  %v560_v38 = vld [vmem:[#allocation5 + $0x110] ss:$12 sps:$4 sm:$0xff]  }
  0x45   :  { %v57_v40 = vld [vmem:[#allocation2 + $0x10] sm:$0xff]  ;;  %v60_v42 = vld [vmem:[#allocation2 + $0x28] sm:$0xff]  ;;  %v62_v43 = vld [vmem:[#allocation2 + $0x38] sm:$0xff]  ;;  %v127_v51 = vsub.s32 2, %v118_v50  ;;  %v119_v53 = vsub.s32 0, %v118_v50  ;;  %v123_v54 = vsub.s32 1, %v118_v50 }
  0x46   :  { %391 = vmatpush1.bf16.msra.mxu1 %v528_v11  ;;  %338 = vmatpush1.bf16.msra.mxu0 %v529_v12  ;;  %v561_v41 = vld [vmem:[#allocation5 + $0x108] ss:$12 sps:$4 sm:$0xff]   ;;  %v63_v44 = vpack.c.bf16 %v57_v40, %v55_v39  ;;  %v66_v45 = vpack.c.bf16 %v62_v43, %v60_v42  ;;  %v59_v46 = vld [vmem:[#allocation2 + $0x20] sm:$0xff]  ;;  %s664_s2 = smov [#allocation8]  }
  0x47   :  { %392 = vmatprep.subr.bf16.mxu1 %v663_v0  ;;  %339 = vmatprep.subr.bf16.mxu0 %v530_v13  ;;  %v61_v47 = vld [vmem:[#allocation2 + $0x30] sm:$0xff]  ;;  %v115_v52 = vld [vmem:[#allocation7] sm:$0x7]  ;;  %s450_s24 = sshll.u32 %s664_s2, 4  ;;  %s451_s24 = int_to_ptr.vmem [resolvable:$true] %s450_s24 }
  0x48   :  { %v65_v48 = vpack.c.bf16 %v61_v47, %v59_v46  ;;  %v128_v55 = vrot.slane %v115_v52, %v127_v51  ;;  %v120_v56 = vrot.slane %v115_v52, %v119_v53  ;;  %v124_v57 = vrot.slane %v115_v52, %v123_v54  ;;  %s628_s25 = scalar_lea.vmem %s451_s24, 1536  ;;  %p633_p11 = scmp.lt.s32.totalorder %s451_s24, %s451_s24 }
  0x49   :  { %p629_p10 = scmp.ne.s32.totalorder %s451_s24, %s628_s25  ;;  %p634_p12 = scmp.lt.s32.totalorder %s628_s25, %s628_s25 }
  0x4a   :  { %393 = vmatpush1.bf16.msra.mxu1 %v532_v14  ;;  %340 = vmatpush1.bf16.msra.mxu0 %v533_v15 }
  0x4b   :  { %394 = vmatprep.subr.bf16.mxu1 %v663_v0  ;;  %341 = vmatprep.subr.bf16.mxu0 %v534_v16  ;;  %p635_p13 = por %p634_p12, %p633_p11 }
  0x4d   :  { %p636_p0 = pnand %p635_p13, %p629_p10 }
  0x4e   :  { %395 = vmatpush1.bf16.msra.mxu1 %v536_v17  ;;  %342 = vmatpush1.bf16.msra.mxu0 %v537_v18 }
  0x4f   :  { %396 = vmatprep.subr.bf16.mxu1 %v663_v0  ;;  %343 = vmatprep.subr.bf16.mxu0 %v538_v19 }
  0x52   :  { %397 = vmatpush1.bf16.msra.mxu1 %v540_v20  ;;  %344 = vmatpush1.bf16.msra.mxu0 %v541_v21 }
  0x53   :  { %398 = vmatprep.subr.bf16.mxu1 %v663_v0  ;;  %345 = vmatprep.subr.bf16.mxu0 %v542_v22 }
  0x56   :  { %399 = vmatpush1.bf16.msra.mxu1 %v544_v23  ;;  %346 = vmatpush1.bf16.msra.mxu0 %v545_v24 }
  0x57   :  { %400 = vmatprep.subr.bf16.mxu1 %v663_v0  ;;  %347 = vmatprep.subr.bf16.mxu0 %v546_v27 }
  0x5a   :  { %401 = vmatpush1.bf16.msra.mxu1 %v548_v29  ;;  %348 = vmatpush1.bf16.msra.mxu0 %v549_v30 }
  0x5b   :  { %402 = vmatprep.subr.bf16.mxu1 %v663_v0  ;;  %349 = vmatprep.subr.bf16.mxu0 %v550_v31 }
  0x5e   :  { %403 = vmatpush1.bf16.msra.mxu1 %v552_v32  ;;  %350 = vmatpush1.bf16.msra.mxu0 %v553_v33 }
  0x5f   :  { %404 = vmatprep.subr.bf16.mxu1 %v663_v0  ;;  %351 = vmatprep.subr.bf16.mxu0 %v554_v34 }
  0x62   :  { %405 = vmatpush1.bf16.msra.mxu1 %v556_v35  ;;  %352 = vmatpush1.bf16.msra.mxu0 %v557_v36 }
  0x63   :  { %406 = vmatprep.subr.bf16.mxu1 %v663_v0  ;;  %353 = vmatprep.subr.bf16.mxu0 %v558_v37 }
  0x66   :  { %407 = vmatpush1.bf16.msra.mxu1 %v560_v38  ;;  %354 = vmatpush1.bf16.msra.mxu0 %v561_v41 }
  0x69   :  { %417 = vmatmul.mubr.bf16.vlgmr.msra.gmra.mrb[0].mxu1 %v63_v44  ;;  %364 = vmatmul.mubr.bf16.vlgmr.msra.gmra.mrb[0].mxu0 %v63_v44 }
  0x6a   :  { %502 = vmatprep.mubr.msk.bf16.mxu1 %vm324_vm0, %v66_v45  ;;  %500 = vmatprep.mubr.msk.bf16.mxu0 %vm324_vm0, %v66_v45 }
  0x71   :  { %425 = vmatmul.mubr.bf16.gmra.mrb[4].mxu1 %v65_v48  ;;  %374 = vmatmul.mubr.bf16.gmra.mrb[4].mxu0 %v65_v48 }
 0x13c   :  { %v418_v58 = vpop.f32.mrb[0].mxu1  ;;  %v365_v60 = vpop.f32.mrb[0].mxu0 }
 0x13d   :  { %v419_v59 = vadd.f32 %v418_v58, %v128_v55  ;;  %v420_v61 = vpop.f32.mrb[1].mxu1  ;;  %v366_v62 = vadd.f32 %v365_v60, %v120_v56  ;;  %v367_v63 = vpop.f32.mrb[1].mxu0 }
 0x13e   :  { %v421_v0 = vpop.f32.mrb[2].mxu1  ;;  %v368_v1 = vadd.f32 %v367_v63, %v124_v57  ;;  %v369_v3 = vpop.f32.mrb[2].mxu0 }
 0x13f   :  { %435 = vst [vmem:[#allocation8 + $0x10] sm:$0xff] %v419_v59  ;;  %v422_v2 = vadd.f32 %v421_v0, %v128_v55  ;;  %v423_v4 = vpop.f32.mrb[3].mxu1  ;;  %433 = vst [vmem:[#allocation8] sm:$0xff] %v366_v62  ;;  %v370_v5 = vadd.f32 %v369_v3, %v120_v56  ;;  %v371_v6 = vpop.f32.mrb[3].mxu0 }
 0x140   :  { %434 = vst [vmem:[#allocation8 + $0x8] sm:$0xff] %v368_v1  ;;  %v372_v7 = vadd.f32 %v371_v6, %v124_v57 }
 0x141   :  { %438 = vst [vmem:[#allocation8 + $0x28] sm:$0xff] %v422_v2  ;;  %436 = vst [vmem:[#allocation8 + $0x18] sm:$0xff] %v370_v5 }
 0x142   :  { %437 = vst [vmem:[#allocation8 + $0x20] sm:$0xff] %v372_v7 }
 0x144   :  { %v426_v8 = vpop.f32.mrb[4].mxu1  ;;  %v375_v10 = vpop.f32.mrb[4].mxu0 }
 0x145   :  { %v427_v9 = vadd.f32 %v426_v8, %v128_v55  ;;  %v428_v11 = vpop.f32.mrb[5].mxu1  ;;  %v376_v12 = vadd.f32 %v375_v10, %v120_v56  ;;  %v377_v13 = vpop.f32.mrb[5].mxu0 }
 0x146   :  { %v429_v14 = vpop.f32.mrb[6].mxu1  ;;  %v378_v15 = vadd.f32 %v377_v13, %v124_v57  ;;  %v379_v17 = vpop.f32.mrb[6].mxu0 }
 0x147   :  { %441 = vst [vmem:[#allocation8 + $0x40] sm:$0xff] %v427_v9  ;;  %v430_v16 = vadd.f32 %v429_v14, %v128_v55  ;;  %v431_v18 = vpop.f32.mrb[7].mxu1  ;;  %439 = vst [vmem:[#allocation8 + $0x30] sm:$0xff] %v376_v12  ;;  %v380_v19 = vadd.f32 %v379_v17, %v120_v56  ;;  %v381_v20 = vpop.f32.mrb[7].mxu0 }
 0x148   :  { %440 = vst [vmem:[#allocation8 + $0x38] sm:$0xff] %v378_v15  ;;  %v382_v21 = vadd.f32 %v381_v20, %v124_v57 }
 0x149   :  { %444 = vst [vmem:[#allocation8 + $0x58] sm:$0xff] %v430_v16  ;;  %442 = vst [vmem:[#allocation8 + $0x48] sm:$0xff] %v380_v19 }
 0x14a   :  { %443 = vst [vmem:[#allocation8 + $0x50] sm:$0xff] %v382_v21 }
 0x14b   :  { %639 = shalt.err (!%p636_p0)
}
 0x14c   :  { %s640_s28 = scalar_lea.hbm %s754_s3, 1536 }
 0x14d   :  { %p641_p1 = scmp.ne.s32.totalorder %s754_s3, %s640_s28  ;;  %p644_p2 = scmp.lt.u32.totalorder %s640_s28, %s754_s3 }
 0x14f   :  { %p646_p3 = pnand %p644_p2, %p641_p1 }
 0x151   :  { %649 = shalt.err (!%p646_p3)
}
 0x152   :  { %s665_s6 = smov 384   ;;  %s666_s7 = smov 24  }
 0x153   :  { %456 = dma.vmem_to_hbm [thread:$0]  %s451_s24, 1536, %s754_s3, [#allocation4], %s665_s6, %s665_s6, %s666_s7  }
 0x154   :  { %654 = dma.done.wait [#allocation4], 1536  }
 0x155   :  { %655 = vsyncadd [#allocation4], 4294965760 }
 0x156   :  { %460 = vsyncpa [#allocation3], 1 }
 0x157   :  { %461 = vsyncpa [#allocation6], 1 }
 0x158   :  { %462 = vsyncpa [#allocation4], 1 }

</bundles_post_ra>
